<compile_context>
chip_gen: v6e
topology: v6e:2x2x1
jax: 0.10.0
libtpu: 0.0.40
codegen_flags: <defaults>
</compile_context>

<pallas_src>
import functools

import jax
import jax.numpy as jnp
import numpy as np
from jax.experimental import pallas as pl
from jax.experimental.pallas import tpu as pltpu

# ---------------- model hyper-params (small, consistent with the module) ----
ITEMS_NUM = 32       # rec.items_num
EMB_DIM = 32         # rec.emb_dim
MAX_LEN = 8          # rec.max_len (sequence length of x)
MAX_EMB_NORM = 1.0   # rec.max_emb_norm
BATCH = 2


# ------------------------------- Pallas kernel ------------------------------
def simple_mean_kernel(idx_ref, emb_ref, o_ref, *,
                       batch, seq_len, items_num, max_norm):
    BL = batch * seq_len

    # --- max_norm renorm hoisted onto the table rows (N of them) ------------
    emb = emb_ref[...]                                             # (N, E) f32
    sq = jnp.sum(emb * emb, axis=-1, keepdims=True)                # (N, 1)
    # torch: max_norm / (norm + 1e-7) when norm > max_norm; rsqrt form differs
    # by O(1e-7) relative, well inside tolerance, and runs on the EUP slot.
    scale = jnp.where(sq > max_norm * max_norm,
                      max_norm * jax.lax.rsqrt(jnp.maximum(sq, 1e-12)),
                      1.0)
    emb_rn = emb * scale                       # padding row: sq=0 -> scale=1 -> stays 0

    # --- one-hot of the flattened indices, built in-kernel from iota --------
    ids = idx_ref[...]                                             # (BL, 1) int32
    cols = jax.lax.broadcasted_iota(jnp.int32, (BL, items_num), 1)
    onehot = (cols == ids).astype(jnp.float32)                     # (BL, N)

    # --- averaging matrix: block-diagonal rows of 1/seq_len -----------------
    r = jax.lax.broadcasted_iota(jnp.int32, (batch, BL), 0)
    c = jax.lax.broadcasted_iota(jnp.int32, (batch, BL), 1)
    mean_m = jnp.where((c >= r * seq_len) & (c < (r + 1) * seq_len),
                       1.0 / seq_len, 0.0).astype(jnp.float32)     # (B, BL)

    # --- reassociated matmuls: (B,BL)@(BL,N) -> (B,N); (B,N)@(N,E) -> (B,E) -
    counts = jnp.dot(mean_m, onehot, preferred_element_type=jnp.float32)
    o_ref[...] = jnp.dot(counts, emb_rn, preferred_element_type=jnp.float32)


# ------------------------------- wrapper -------------------------------------
def simple_mean_forward(x, emb):
    """x: (B, L) int32 item ids;  emb: (items_num, emb_dim) f32 table."""
    B, L = x.shape
    N, E = emb.shape

    # fold batch into rows once, outside the kernel (no in-kernel relayout)
    idx2d = x.reshape(B * L, 1).astype(jnp.int32)

    kernel = functools.partial(
        simple_mean_kernel, batch=B, seq_len=L, items_num=N,
        max_norm=MAX_EMB_NORM)

    return pl.pallas_call(
        kernel,
        out_shape=jax.ShapeDtypeStruct((B, E), jnp.float32),
        in_specs=[
            pl.BlockSpec(memory_space=pltpu.MemorySpace.VMEM),  # indices
            pl.BlockSpec(memory_space=pltpu.MemorySpace.VMEM),  # embedding table
        ],
        out_specs=pl.BlockSpec(memory_space=pltpu.MemorySpace.VMEM),
    )(idx2d, emb.astype(jnp.float32))


# ------------------------- pure-JAX reference (torch semantics) --------------
def reference_forward(x, emb):
    z = jnp.take(emb, x, axis=0)                                   # (B, L, E)
    norms = jnp.linalg.norm(z, axis=-1, keepdims=True)
    scale = jnp.where(norms > MAX_EMB_NORM, MAX_EMB_NORM / (norms + 1e-7), 1.0)
    z = z * scale
    return z.mean(axis=1)                                          # (B, E)


# ------------------------------------ main ------------------------------------
if __name__ == "__main__":
    key = jax.random.PRNGKey(0)
    k_emb, k_x = jax.random.split(key, 2)

    # torch.nn.init.uniform_ -> U[0,1); padding row 0 zeroed.
    emb = jax.random.uniform(k_emb, (ITEMS_NUM, EMB_DIM), dtype=jnp.float32)
    emb = emb.at[0].set(0.0)                                       # padding_idx=0

    x = jax.random.randint(k_x, (BATCH, MAX_LEN), 0, ITEMS_NUM, dtype=jnp.int32)

    out = jax.block_until_ready(simple_mean_forward(x, emb))
    ref = jax.block_until_ready(reference_forward(x, emb))

    assert out.shape == (BATCH, EMB_DIM)
    np.testing.assert_allclose(np.asarray(out), np.asarray(ref),
                               rtol=1e-4, atol=1e-5)
    print("KERNEL_OK")
</pallas_src>

<mosaic_0001>
module attributes {stable_mosaic.version = 11 : i64} {
  func.func @simple_mean_kernel(%arg0: memref<16x1xi32, #tpu.memory_space<vmem>>, %arg1: memref<32x32xf32, #tpu.memory_space<vmem>>, %arg2: memref<2x32xf32, #tpu.memory_space<vmem>>) attributes {dimension_semantics = [], scalar_prefetch = 0 : i64, scratch_operands = 0 : i64, tpu.core_type = #tpu.core_type<tc>} {
    %c0 = arith.constant 0 : index
    %c0_0 = arith.constant 0 : index
    %0 = vector.load %arg1[%c0, %c0_0] : memref<32x32xf32, #tpu.memory_space<vmem>>, vector<32x32xf32>
    %1 = arith.mulf %0, %0 : vector<32x32xf32>
    %cst = arith.constant dense<0.000000e+00> : vector<32xf32>
    %2 = vector.multi_reduction <add>, %1, %cst [1] : vector<32x32xf32> to vector<32xf32>
    %3 = vector.shape_cast %2 : vector<32xf32> to vector<32x1xf32>
    %cst_1 = arith.constant 1.000000e+00 : f32
    %4 = vector.broadcast %cst_1 : f32 to vector<32x1xf32>
    %5 = arith.cmpf ogt, %3, %4 : vector<32x1xf32>
    %cst_2 = arith.constant 9.99999996E-13 : f32
    %6 = vector.broadcast %cst_2 : f32 to vector<32x1xf32>
    %7 = arith.maximumf %3, %6 : vector<32x1xf32>
    %8 = math.rsqrt %7 : vector<32x1xf32>
    %cst_3 = arith.constant 1.000000e+00 : f32
    %9 = vector.broadcast %cst_3 : f32 to vector<32x1xf32>
    %10 = arith.mulf %9, %8 : vector<32x1xf32>
    %cst_4 = arith.constant 1.000000e+00 : f32
    %11 = vector.broadcast %cst_4 : f32 to vector<32x1xf32>
    %12 = arith.select %5, %10, %11 : vector<32x1xi1>, vector<32x1xf32>
    %13 = vector.broadcast %12 : vector<32x1xf32> to vector<32x32xf32>
    %14 = arith.mulf %0, %13 : vector<32x32xf32>
    %c0_5 = arith.constant 0 : index
    %c0_6 = arith.constant 0 : index
    %15 = vector.load %arg0[%c0_5, %c0_6] : memref<16x1xi32, #tpu.memory_space<vmem>>, vector<16x1xi32>
    %16 = tpu.iota {dimensions = array<i32: 1>} : vector<16x32xi32>
    %17 = vector.broadcast %15 : vector<16x1xi32> to vector<16x32xi32>
    %18 = arith.cmpi eq, %16, %17 : vector<16x32xi32>
    %19 = arith.extui %18 : vector<16x32xi1> to vector<16x32xi32>
    %20 = arith.sitofp %19 : vector<16x32xi32> to vector<16x32xf32>
    %21 = tpu.iota {dimensions = array<i32: 0>} : vector<2x16xi32>
    %22 = tpu.iota {dimensions = array<i32: 1>} : vector<2x16xi32>
    %c8_i32 = arith.constant 8 : i32
    %23 = vector.broadcast %c8_i32 : i32 to vector<2x16xi32>
    %24 = arith.muli %21, %23 : vector<2x16xi32>
    %25 = arith.cmpi sge, %22, %24 : vector<2x16xi32>
    %c1_i32 = arith.constant 1 : i32
    %26 = vector.broadcast %c1_i32 : i32 to vector<2x16xi32>
    %27 = arith.addi %21, %26 : vector<2x16xi32>
    %c8_i32_7 = arith.constant 8 : i32
    %28 = vector.broadcast %c8_i32_7 : i32 to vector<2x16xi32>
    %29 = arith.muli %27, %28 : vector<2x16xi32>
    %30 = arith.cmpi slt, %22, %29 : vector<2x16xi32>
    %31 = arith.andi %25, %30 : vector<2x16xi1>
    %cst_8 = arith.constant 1.250000e-01 : f32
    %cst_9 = arith.constant 0.000000e+00 : f32
    %32 = vector.broadcast %cst_8 : f32 to vector<2x16xf32>
    %33 = vector.broadcast %cst_9 : f32 to vector<2x16xf32>
    %34 = arith.select %31, %32, %33 : vector<2x16xi1>, vector<2x16xf32>
    %cst_10 = arith.constant dense<0.000000e+00> : vector<2x32xf32>
    %35 = tpu.matmul %34, %20, %cst_10 {dimension_numbers = #tpu.dot_dimension_numbers<[1], [0], [0], [1], [0, 0, 1, 1], [], []>} : vector<2x16xf32>, vector<16x32xf32>, vector<2x32xf32> -> vector<2x32xf32>
    %cst_11 = arith.constant dense<0.000000e+00> : vector<2x32xf32>
    %36 = tpu.matmul %35, %14, %cst_11 {dimension_numbers = #tpu.dot_dimension_numbers<[1], [0], [0], [1], [0, 0, 1, 1], [], []>} : vector<2x32xf32>, vector<32x32xf32>, vector<2x32xf32> -> vector<2x32xf32>
    %c0_12 = arith.constant 0 : index
    %c0_13 = arith.constant 0 : index
    %37 = vector.load %arg2[%c0_12, %c0_13] : memref<2x32xf32, #tpu.memory_space<vmem>>, vector<2x32xf32>
    tpu.vector_store %arg2[%c0_12, %c0_13], %36 {strides = array<i32>} : memref<2x32xf32, #tpu.memory_space<vmem>>, vector<2x32xf32>,
    return
  }
}

</mosaic_0001>

<bundles_post_ra>
// kernel: tpu_custom_call.1
= control target key start
LH: loop header
LB: loop body
LE: loop exit
PB: predicated region body
PF: predicated region fallthrough
CT: control target
= control target key end

     0   :  { %7 = vsyncpa [#allocation3], 0  ;;  %s403_s0 = inlined_call_operand.vmem [shape: s32[16,1], index: 0, kind: input, shape index: {}]   ;;  %s404_s1 = inlined_call_operand.hbm [shape: f32[32,32], index: 1, kind: input, shape index: {}]   ;;  %s405_s2 = inlined_call_operand.hbm [shape: f32[2,32], index: 2, kind: output, shape index: {}]  }
   0x1   :  { %8 = vsyncpa [#allocation4], 0  ;;  %s349_s9 = smov [#allocation2]  }
   0x2   :  { %s16_s10 = sshll.u32 %s349_s9, 4  ;;  %s17_s10 = int_to_ptr.vmem [resolvable:$true] %s16_s10 }
   0x3   :  { %s313_s11 = scalar_lea.vmem %s17_s10, 512  ;;  %p318_p1 = scmp.lt.s32.totalorder %s17_s10, %s17_s10 }
   0x4   :  { %p314_p0 = scmp.ne.s32.totalorder %s17_s10, %s313_s11  ;;  %p319_p2 = scmp.lt.s32.totalorder %s313_s11, %s313_s11 }
   0x6   :  { %p320_p3 = por %p319_p2, %p318_p1 }
   0x8   :  { %p321_p4 = pnand %p320_p3, %p314_p0 }
   0xa   :  { %324 = shalt.err (!%p321_p4)
}
   0xb   :  { %s350_s12 = smov 128   ;;  %s351_s13 = smov 8  }
   0xc   :  { %22 = dma.hbm_to_vmem [thread:$0]  %s404_s1, 512, %s17_s10, [#allocation3], %s350_s12, %s350_s12, %s351_s13  }
   0xd   :  { %345 = dma.done.wait [#allocation3], 512  }
   0xe   :  { %346 = vsyncadd [#allocation3], 4294966784  ;;  %v352_v0 = vmov 0   ;;  %v353_v1 = vmov 0.0   ;;  %v68_v2 = vld [vmem:[%s403_s0 + $0x8] sm:$0xff]  ;;  %v67_v3 = vld [vmem:[%s403_s0] sm:$0xff]  ;;  %v69_v16 = vlaneseq }
   0xf   :  { %296 = vset.pattern.permute.xlu0 %v352_v0  ;;  %270 = vmatprep.subr.mxu0 %v353_v1  ;;  %vm354_vm0 = vmmov 0   ;;  %v29_v4 = vld [vmem:[#allocation2 + $0x18] sm:$0xff]  ;;  %vm34_vm1 = vcmask 261120   ;;  %v28_v5 = vld [vmem:[#allocation2 + $0x10] sm:$0xff]  ;;  %v385_v8 = vld [vmem:[#allocation2] sm:$0xff]  ;;  %v355_v23 = vmov 1.0  }
  0x10   :  { %277 = vmatprep.subr.mxu1 %v353_v1  ;;  %75 = vperm.xlu0 %296, %v68_v2   ;;  %v33_v6 = vmul.f32 %v29_v4, %v29_v4  ;;  %v32_v7 = vmul.f32 %v28_v5, %v28_v5  ;;  %v30_v11 = vmul.f32 %v385_v8, %v385_v8  ;;  %v27_v13 = vld [vmem:[#allocation2 + $0x8] sm:$0xff]  ;;  %v84_v17 = vshrl.u32 %v69_v16, 7  ;;  %s356_s0 = smov [#allocation5]  }
  0x11   :  { %274 = vmatprep.mubr.msk.f32.mxu0 %vm354_vm0, %v353_v1  ;;  %285 = vmatprep.mubr.msk.f32.mxu1 %vm354_vm0, %v353_v1  ;;  %v31_v14 = vmul.f32 %v27_v13, %v27_v13  ;;  %v70_v21 = vand.u32 127, %v69_v16  ;;  %vm92_vm6 = vcmask 130048   ;;  %s247_s1 = sshll.u32 %s356_s0, 4  ;;  %vm239_vm12 = vcmask 254976   ;;  %s248_s1 = int_to_ptr.vmem [resolvable:$true] %s247_s1 }
  0x12   :  { %v44_v9 = vsel %vm34_vm1, %v33_v6, 0.0  ;;  %v41_v10 = vsel %vm34_vm1, %v32_v7, 0.0  ;;  %v35_v12 = vsel %vm34_vm1, %v30_v11, 0.0  ;;  %v87_v18 = vadd.s32 1, %v84_v17  ;;  %s325_s20 = scalar_lea.vmem %s248_s1, 32  ;;  %p330_p6 = scmp.lt.s32.totalorder %s248_s1, %s248_s1 }
  0x13   :  { %45 = vadd.xlane.f32.xlu1 %v44_v9  ;;  %v38_v15 = vsel %vm34_vm1, %v31_v14, 0.0  ;;  %v85_v19 = vmul.u32 8, %v84_v17  ;;  %p326_p5 = scmp.ne.s32.totalorder %s248_s1, %s325_s20  ;;  %p331_p7 = scmp.lt.s32.totalorder %s325_s20, %s325_s20 }
  0x14   :  { %72 = vperm.xlu0 %296, %v67_v3   ;;  %v88_v20 = vmul.u32 8, %v87_v18 }
  0x15   :  { %vm86_vm2 = vcmp.ge.s32.totalorder %v70_v21, %v85_v19  ;;  %p332_p8 = por %p331_p7, %p330_p6 }
  0x16   :  { %vm89_vm3 = vcmp.lt.s32.totalorder %v70_v21, %v88_v20 }
  0x17   :  { %42 = vadd.xlane.f32.xlu1 %v41_v10  ;;  %vm90_vm5 = vmand %vm86_vm2, %vm89_vm3  ;;  %p333_p9 = pnand %p332_p8, %p326_p5 }
  0x18   :  { %v91_v25 = vsel %vm90_vm5, 0.125, %v353_v1 }
  0x1b   :  { %36 = vadd.xlane.f32.xlu1 %v35_v12 }
  0x33   :  { %39 = vadd.xlane.f32.xlu0 %v38_v15 }
  0x8b   :  { %v76_v22 = vpop.permute.xlu0 %75 }
  0x8c   :  { %vm78_vm4 = vcmp.eq.s32.totalorder %v70_v21, %v76_v22 }
  0x8d   :  { %271 = vmatpush3.msk.msra.mxu0 %vm78_vm4, %v355_v23 }
  0x8e   :  { %272 = vmatprep.subr.mxu0 %v353_v1 }
  0x8f   :  { %v73_v24 = vpop.permute.xlu0 %72 }
  0x90   :  { %vm77_vm7 = vcmp.eq.s32.totalorder %v70_v21, %v73_v24 }
  0x91   :  { %273 = vmatpush3.msk.msra.mxu0 %vm77_vm7, %v355_v23 }
  0x92   :  { %275 = vmatmul.mubr.msk.f32.vlgmr.msra.gmra.mxu0 %vm92_vm6, %v91_v25 }
  0x9c   :  { %v46_v26 = vpop.xlane.xlu1 %45 }
  0x9d   :  { %v54_v27 = vmax.f32 %v46_v26, 1e-12  ;;  %vm50_vm8 = vcmp.gt.f32.partialorder %v46_v26, 1.0 }
  0x9f   :  { %297 = vrsqrt.f32 %v54_v27 }
  0xa0   :  { %v43_v28 = vpop.xlane.xlu1 %42 }
  0xa1   :  { %v53_v29 = vmax.f32 %v43_v28, 1e-12  ;;  %vm49_vm9 = vcmp.gt.f32.partialorder %v43_v28, 1.0 }
  0xa3   :  { %299 = vrsqrt.f32 %v53_v29 }
  0xa4   :  { %v37_v35 = vpop.xlane.xlu1 %36 }
  0xa5   :  { %v51_v37 = vmax.f32 %v37_v35, 1e-12  ;;  %vm47_vm10 = vcmp.gt.f32.partialorder %v37_v35, 1.0 }
  0xa7   :  { %301 = vrsqrt.f32 %v51_v37 }
  0xac   :  { %v298_v30 = vpop.eup %297 }
  0xad   :  { %v62_v31 = vsel %vm50_vm8, %v298_v30, 1.0 }
  0xae   :  { %v66_v32 = vmul.f32 %v62_v31, %v29_v4 }
  0xb0   :  { %v300_v33 = vpop.eup %299  ;;  %278 = vmatpush3.msra.mxu1 %v66_v32 }
  0xb1   :  { %v61_v34 = vsel %vm49_vm9, %v300_v33, 1.0  ;;  %279 = vmatprep.subr.mxu1 %v353_v1 }
  0xb2   :  { %v65_v36 = vmul.f32 %v61_v34, %v28_v5 }
  0xb4   :  { %280 = vmatpush3.msra.mxu1 %v65_v36  ;;  %v302_v40 = vpop.eup %301 }
  0xb5   :  { %281 = vmatprep.subr.mxu1 %v353_v1  ;;  %v59_v41 = vsel %vm47_vm10, %v302_v40, 1.0 }
  0xb6   :  { %v63_v45 = vmul.f32 %v59_v41, %v385_v8 }
  0xbc   :  { %v40_v38 = vpop.xlane.xlu0 %39 }
  0xbd   :  { %v52_v39 = vmax.f32 %v40_v38, 1e-12  ;;  %vm48_vm11 = vcmp.gt.f32.partialorder %v40_v38, 1.0 }
  0xbf   :  { %303 = vrsqrt.f32 %v52_v39 }
  0xcc   :  { %v304_v42 = vpop.eup %303 }
  0xcd   :  { %v60_v43 = vsel %vm48_vm11, %v304_v42, 1.0 }
  0xce   :  { %v64_v44 = vmul.f32 %v60_v43, %v27_v13 }
  0xd0   :  { %282 = vmatpush3.msra.mxu1 %v64_v44 }
  0xd1   :  { %283 = vmatprep.subr.mxu1 %v353_v1 }
  0xd2   :  { %284 = vmatpush3.msra.mxu1 %v63_v45 }
 0x152   :  { %v162_v46 = vpop.f32.mrf.mxu0 }
 0x153   :  { %286 = vmatmul.mubr.msk.f32.vlgmr.msra.gmra.mxu1 %vm34_vm1, %v162_v46 }
 0x154   :  { %v276_v47 = vpop.f32.mrf.mxu0 }
 0x213   :  { %v235_v48 = vpop.f32.mrf.mxu1 }
 0x214   :  { %240 = vst.msk [vmem:[#allocation5] sm:$0x3] %vm239_vm12, %v235_v48 }
 0x215   :  { %v287_v49 = vpop.f32.mrf.mxu1 }
 0x216   :  { %336 = shalt.err (!%p333_p9)
}
 0x217   :  { %250 = dma.vmem_to_hbm [thread:$0]  %s248_s1, 32, %s405_s2, [#allocation4]  }
 0x218   :  { %347 = dma.done.wait [#allocation4], 32  }
 0x219   :  { %348 = vsyncadd [#allocation4], 4294967264 }
 0x21a   :  { %254 = vsyncpa [#allocation3], 1 }
 0x21b   :  { %255 = vsyncpa [#allocation4], 1 }

</bundles_post_ra>
